<compile_context>
chip_gen: v5e
topology: v5e:2x2
jax: 0.10.0
libtpu: 0.0.40
codegen_flags: <defaults>
</compile_context>

<pallas_src>
import math

import jax
import jax.numpy as jnp
from jax import lax
from jax.experimental import pallas as pl
from jax.experimental.pallas import tpu as pltpu


def _linear_kernel_acc(x_ref, w_ref, b_ref, o_ref, acc_ref):
    # x_ref: (tm, tk), w_ref: (tn, tk), b_ref: (1, tn), o_ref: (tm, tn)
    k = pl.program_id(2)

    @pl.when(k == 0)
    def _():
        acc_ref[...] = jnp.zeros_like(acc_ref)

    # Contract on D with the weight kept in (N, D) layout (MXU trans_b).
    acc_ref[...] += lax.dot_general(
        x_ref[...], w_ref[...],
        dimension_numbers=(((1,), (1,)), ((), ())),
        preferred_element_type=jnp.float32)

    @pl.when(k == pl.num_programs(2) - 1)
    def _():
        o_ref[...] = (acc_ref[...] + b_ref[...].astype(jnp.float32)).astype(o_ref.dtype)


def _linear_kernel_single_k(x_ref, w_ref, b_ref, o_ref):
    # Whole contraction dim fits in one tile: no scratch accumulator needed.
    acc = lax.dot_general(
        x_ref[...], w_ref[...],
        dimension_numbers=(((1,), (1,)), ((), ())),
        preferred_element_type=jnp.float32)
    o_ref[...] = (acc + b_ref[...].astype(jnp.float32)).astype(o_ref.dtype)


def _round_up(x, mult):
    return (x + mult - 1) // mult * mult


def _pick_tm(m):
    # Largest MXU-friendly row tile that still leaves >= 2 grid steps
    # (pipelining + megacore). Second-to-last block dim must be a multiple
    # of 8 or the full extent.
    if m <= 8:
        return m
    for cand in (256, 128, 64, 32, 16, 8):
        if m >= 2 * cand:
            return cand
    return 8


def _pick_tn(n_pad):
    # n_pad is already a multiple of 128; tile it so the weight streams.
    for cand in (512, 256, 128):
        if n_pad % cand == 0 and n_pad > cand:
            return cand
    return n_pad


def _pick_tk(d):
    # Only tile K when it divides evenly (partial K tiles would feed
    # undefined padding into the accumulator).
    for cand in (512, 256, 128):
        if d % cand == 0 and d > cand:
            return cand
    return d


def learnable_metrix(x, weight, bias, *, compute_dtype=None):
    """y = x @ weight.T + bias  (torch.nn.Linear semantics).

    x:      (..., d_model)
    weight: (total_bank_tokens, d_model)   -- PyTorch layout, NOT transposed
    bias:   (total_bank_tokens,)
    compute_dtype: optional MXU operand dtype (e.g. jnp.bfloat16).
      Accumulation stays f32, output keeps x.dtype. None = no downcast.
    """
    out_dtype = x.dtype
    d_model = x.shape[-1]
    n_out = weight.shape[0]
    lead_shape = x.shape[:-1]
    m = math.prod(lead_shape) if lead_shape else 1

    x2d = x.reshape(m, d_model)
    if compute_dtype is not None:
        x2d = x2d.astype(compute_dtype)
        weight = weight.astype(compute_dtype)

    # Lane-dense output: pad N up to a multiple of 128 (no-op if already dense).
    n_pad = max(_round_up(n_out, 128), 128)
    if n_pad != n_out:
        weight = jnp.pad(weight, ((0, n_pad - n_out), (0, 0)))
        bias = jnp.pad(bias, (0, n_pad - n_out))
    b2d = bias.reshape(1, n_pad)

    tm = _pick_tm(m)
    tn = _pick_tn(n_pad)
    tk = _pick_tk(d_model)
    grid_k = d_model // tk
    grid = (pl.cdiv(m, tm), n_pad // tn, grid_k)

    bytes_accessed = (
        x2d.size * x2d.dtype.itemsize
        + weight.size * weight.dtype.itemsize
        + b2d.size * b2d.dtype.itemsize
        + m * n_pad * jnp.dtype(out_dtype).itemsize)

    if grid_k == 1:
        kernel = _linear_kernel_single_k
        scratch_shapes = []
    else:
        kernel = _linear_kernel_acc
        scratch_shapes = [pltpu.VMEM((tm, tn), jnp.float32)]

    out = pl.pallas_call(
        kernel,
        out_shape=jax.ShapeDtypeStruct((m, n_pad), out_dtype),
        grid_spec=pltpu.PrefetchScalarGridSpec(
            num_scalar_prefetch=0,
            grid=grid,
            in_specs=[
                pl.BlockSpec((tm, tk), lambda i, j, k: (i, k)),   # x
                pl.BlockSpec((tn, tk), lambda i, j, k: (j, k)),   # weight (N, D)
                pl.BlockSpec((1, tn), lambda i, j, k: (0, j)),    # bias
            ],
            out_specs=pl.BlockSpec((tm, tn), lambda i, j, k: (i, j)),
            scratch_shapes=scratch_shapes,
        ),
        compiler_params=pltpu.CompilerParams(
            dimension_semantics=("parallel", "parallel", "arbitrary"),
        ),
        cost_estimate=pl.CostEstimate(
            flops=2 * m * d_model * n_pad,
            transcendentals=0,
            bytes_accessed=bytes_accessed),
    )(x2d, weight, b2d)

    if n_pad != n_out:
        out = out[:, :n_out]
    return out.reshape(*lead_shape, n_out)


if __name__ == "__main__":
    # Small shapes consistent with the module: d_model=32, total_bank_tokens=64.
    batch, seq, d_model, total_bank_tokens = 2, 8, 32, 64

    key = jax.random.PRNGKey(0)
    kx, kw, kb = jax.random.split(key, 3)

    x = jax.random.normal(kx, (batch, seq, d_model), dtype=jnp.float32)
    weight = jax.random.normal(kw, (total_bank_tokens, d_model), dtype=jnp.float32) * 0.05
    bias = jax.random.normal(kb, (total_bank_tokens,), dtype=jnp.float32) * 0.01

    y = learnable_metrix(x, weight, bias)
    y = jax.block_until_ready(y)

    # Reference check in plain JAX (f32 nn.Linear semantics).
    y_ref = x @ weight.T + bias
    assert y.shape == (batch, seq, total_bank_tokens), y.shape
    max_err = float(jnp.max(jnp.abs(y - y_ref)))
    assert jnp.allclose(y, y_ref, atol=1e-5, rtol=1e-5), max_err

    print("KERNEL_OK")
</pallas_src>

<mosaic_0001>
module attributes {stable_mosaic.version = 11 : i64} {
  func.func @_linear_kernel_single_k(%arg0: i32, %arg1: i32, %arg2: i32, %arg3: memref<8x32xf32, #tpu.memory_space<vmem>>, %arg4: memref<128x32xf32, #tpu.memory_space<vmem>>, %arg5: memref<1x128xf32, #tpu.memory_space<vmem>>, %arg6: memref<8x128xf32, #tpu.memory_space<vmem>>) attributes {dimension_semantics = [#tpu.dimension_semantics<parallel>, #tpu.dimension_semantics<parallel>, #tpu.dimension_semantics<arbitrary>], iteration_bounds = array<i64: 2, 1, 1>, scalar_prefetch = 0 : i64, scratch_operands = 0 : i64, tpu.core_type = #tpu.core_type<tc>, window_params = [{transform_indices = @transform_0, window_bounds = array<i64: 8, 32>}, {transform_indices = @transform_1, window_bounds = array<i64: 128, 32>}, {transform_indices = @transform_2, window_bounds = array<i64: 1, 128>}, {transform_indices = @transform_3, window_bounds = array<i64: 8, 128>}]} {
    %c0 = arith.constant 0 : index
    %c0_0 = arith.constant 0 : index
    %0 = vector.load %arg3[%c0, %c0_0] : memref<8x32xf32, #tpu.memory_space<vmem>>, vector<8x32xf32>
    %c0_1 = arith.constant 0 : index
    %c0_2 = arith.constant 0 : index
    %1 = vector.load %arg4[%c0_1, %c0_2] : memref<128x32xf32, #tpu.memory_space<vmem>>, vector<128x32xf32>
    %cst = arith.constant dense<0.000000e+00> : vector<8x128xf32>
    %2 = tpu.matmul %0, %1, %cst {dimension_numbers = #tpu.dot_dimension_numbers<[1], [1], [0], [0], [0, 0, 1, 0], [], []>} : vector<8x32xf32>, vector<128x32xf32>, vector<8x128xf32> -> vector<8x128xf32>
    %c0_3 = arith.constant 0 : index
    %c0_4 = arith.constant 0 : index
    %3 = vector.load %arg5[%c0_3, %c0_4] : memref<1x128xf32, #tpu.memory_space<vmem>>, vector<1x128xf32>
    %4 = vector.broadcast %3 : vector<1x128xf32> to vector<8x128xf32>
    %5 = arith.addf %2, %4 : vector<8x128xf32>
    %c0_5 = arith.constant 0 : index
    %c0_6 = arith.constant 0 : index
    %6 = vector.load %arg6[%c0_5, %c0_6] : memref<8x128xf32, #tpu.memory_space<vmem>>, vector<8x128xf32>
    tpu.vector_store %arg6[%c0_5, %c0_6], %5 {strides = array<i32>} : memref<8x128xf32, #tpu.memory_space<vmem>>, vector<8x128xf32>,
    return
  }
  func.func @transform_0(%arg0: i32, %arg1: i32, %arg2: i32) -> (i32, i32) {
    %c0_i32 = arith.constant 0 : i32
    return %arg0, %arg2 : i32, i32
  }
  func.func @transform_1(%arg0: i32, %arg1: i32, %arg2: i32) -> (i32, i32) {
    %c0_i32 = arith.constant 0 : i32
    return %arg1, %arg2 : i32, i32
  }
  func.func @transform_2(%arg0: i32, %arg1: i32, %arg2: i32) -> (i32, i32) {
    %c0_i32 = arith.constant 0 : i32
    %c0_i32_0 = arith.constant 0 : i32
    return %c0_i32, %arg1 : i32, i32
  }
  func.func @transform_3(%arg0: i32, %arg1: i32, %arg2: i32) -> (i32, i32) {
    %c0_i32 = arith.constant 0 : i32
    return %arg0, %arg1 : i32, i32
  }
}

</mosaic_0001>

<bundles_post_ra>
// kernel: tpu_custom_call.1
= control target key start
LH: loop header
LB: loop body
LE: loop exit
PB: predicated region body
PF: predicated region fallthrough
CT: control target
= control target key end

     0   :  { %8 = vsyncpa [#allocation3], 0  ;;  %s811_s0 = inlined_call_operand.vmem [shape: f32[16,32], index: 0, kind: input, shape index: {}]   ;;  %s812_s1 = inlined_call_operand.vmem [shape: f32[128,32], index: 1, kind: input, shape index: {}]   ;;  %s813_s2 = inlined_call_operand.vmem [shape: f32[1,128], index: 2, kind: input, shape index: {}]   ;;  %s814_s3 = inlined_call_operand.hbm [shape: f32[16,128], index: 3, kind: output, shape index: {}]  }
   0x1   :  { %10 = vsyncpa [#allocation3 + $0x1], 0  ;;  %s646_s12 = smov 0   ;;  %s648_s13 = smov 0  }
   0x2   :  { %s650_s14 = smov 0   ;;  %s652_s15 = smov 0  }
   0x3   :  { %s654_s16 = smov 0   ;;  %s656_s17 = smov 0  }
   0x4 LB: > { %s460_s18 = sadd.s32 4294967295, %s624_s17   ;;  %s461_s19 = sadd.s32 4294967294, %s624_s17   ;;  %s624_s17 = sphi %s656_s17, %s16_s17   ;;  %s620_s16 = sphi %s654_s16, %s821_s16   ;;  %s616_s15 = sphi %s652_s15, %s820_s15   ;;  %s612_s14 = sphi %s650_s14, %s819_s14   ;;  %s608_s13 = sphi %s648_s13, %s818_s13   ;;  %s604_s12 = sphi %s646_s12, %s817_s12  }
   0x5   : > { %s35_s20 = sadd.s32 1, %s620_s16  ;;  %s126_s21 = sadd.s32 1, %s612_s14 }
   0x6   : > { %p37_p0 = scmp.ge.s32.totalorder %s35_s20, 2  ;;  %p136_p1 = scmp.ne.s32.totalorder %s612_s14, %s608_s13 }
   0x7   : > { %p137_p2 = scmp.eq.s32.totalorder %s460_s18, 1  ;;  %p142_p3 = scmp.ne.s32.totalorder %s608_s13, %s604_s12 }
   0x8   : > { %s823_s20 = smov (%p37_p0, %s35_s20), 0  ;;  %p143_p5 = scmp.eq.s32.totalorder %s461_s19, 1 }
   0x9   : > { %p686_p4 = por %p137_p2, %p136_p1  ;;  %s121_s23 = ssub.s32 %s620_s16, %s823_s20 }
   0xa   : > { %p466_p6 = scmp.ge.s32.totalorder %s624_s17, 1  ;;  %p124_p7 = scmp.eq.s32.totalorder %s121_s23, 0 }
   0xb   : > { %p693_p8 = por %p143_p5, %p142_p3  ;;  %p189_p9 = scmp.lt.s32.totalorder %s624_s17, 3 }
   0xc   : > { %s699_s25 = scalar_select %p124_p7, %s612_s14, %s126_s21  }
   0xd   : > { %p190_p10 = pnand %p466_p6, %p189_p9 }
   0xe   : > { %p226_p11 = scmp.lt.s32.totalorder (!%p190_p10), %s616_s15, 1  ;;  %s223_s29 = sand.u32 (!%p190_p10), 1, %s608_s13  }
   0xf   : > { %193 = sbr.rel (%p190_p10) target bundleno = 215 (0xd7), region = 32  ;;  %s467_s30 = sshll.u32 (!%p190_p10), %s223_s29, 3 }
  0x10   : > { %s487_s4 = sshll.u32 (!%p190_p10), %s616_s15, 3  ;;  %s566_s27 = scalar_lea.hbm (!%p190_p10), %s814_s3, 16 }
  0x11   : > { %s351_s7 = scalar_lea.hbm (!%p190_p10), %s814_s3, %s487_s4 }
  0x12   : > { %s355_s18 = sshll.u32 (!%p190_p10), %s351_s7, 4  ;;  %s356_s18 = int_to_ptr.hbm [resolvable:$true] %s355_s18 }
  0x13   : > { %s560_s21 = sshra.s32 (!%p190_p10), %s356_s18, 4  ;;  %s561_s21 = int_to_ptr.hbm [resolvable:$true] %s560_s21 }
  0x14   : > { %v261_v0 = vld [vmem:[%s812_s1 + $0x78] sm:$0xff]  ;;  %vm266_vm0 = vcmask 261120   ;;  %v260_v1 = vld [vmem:[%s812_s1 + $0x70] sm:$0xff]  ;;  %v259_v2 = vld [vmem:[%s812_s1 + $0x68] sm:$0xff]  ;;  %s227_s10 = scalar_select %p226_p11, %s616_s15, 1 }
  0x15   : > { %469 = vmatpush.xpose.msk.msra.mxu0 %vm266_vm0, %v261_v0  ;;  %v258_v3 = vld [vmem:[%s812_s1 + $0x60] sm:$0xff]  ;;  %v257_v4 = vld [vmem:[%s812_s1 + $0x58] sm:$0xff]  ;;  %v256_v5 = vld [vmem:[%s812_s1 + $0x50] sm:$0xff]  ;;  %s562_s15 = scalar_lea.hbm %s561_s21, 8  ;;  %p567_p1 = scmp.lt.s32.totalorder %s561_s21, %s814_s3 }
  0x16   : > { %v255_v6 = vld [vmem:[%s812_s1 + $0x48] sm:$0xff]  ;;  %v254_v7 = vld [vmem:[%s812_s1 + $0x40] sm:$0xff]  ;;  %v253_v8 = vld [vmem:[%s812_s1 + $0x38] sm:$0xff]  ;;  %s468_s19 = sshll.u32 %s227_s10, 3  ;;  %s225_s10 = scalar_lea.vmem [#allocation2], %s467_s30 }
  0x17   : > { %v252_v9 = vld [vmem:[%s812_s1 + $0x30] sm:$0xff]  ;;  %v251_v10 = vld [vmem:[%s812_s1 + $0x28] sm:$0xff]  ;;  %v250_v11 = vld [vmem:[%s812_s1 + $0x20] sm:$0xff]  ;;  %s232_s28 = scalar_lea.vmem %s811_s0, %s468_s19  ;;  %s353_s11 = sshll.u32 %s225_s10, 4  ;;  %s354_s11 = int_to_ptr.vmem [resolvable:$true] %s353_s11 }
  0x18   : > { %v249_v12 = vld [vmem:[%s812_s1 + $0x18] sm:$0xff]  ;;  %v248_v13 = vld [vmem:[%s812_s1 + $0x10] sm:$0xff]  ;;  %v247_v14 = vld [vmem:[%s812_s1 + $0x8] sm:$0xff]  ;;  %s340_s19 = scalar_lea.sflag [#allocation3], %s223_s29  ;;  %p563_p12 = scmp.ne.s32.totalorder %s561_s21, %s562_s15 }
  0x19   : > { %470 = vmatpush.xpose.msk.msra.mxu0 %vm266_vm0, %v260_v1  ;;  %v246_v15 = vld [vmem:[%s812_s1] sm:$0xff]  ;;  %p568_p2 = scmp.lt.s32.totalorder %s566_s27, %s562_s15 }
  0x1a   : > { %v245_v16 = vld [vmem:[%s232_s28] sm:$0xff]  ;;  %p564_p13 = pnand %p563_p12, %p686_p4 }
  0x1b   : > { %v545_v17 = vld [vmem:[%s813_s2] ss:$0 sm:$0xff]  ;;  %p569_p3 = por %p568_p2, %p567_p1 }
  0x1c   : > { %p565_p0 = pneg %p564_p13 }
  0x1d   : > { %471 = vmatpush.xpose.msk.msra.mxu0 %vm266_vm0, %v259_v2 }
  0x1e   : > { %p570_p5 = pnand %p569_p3, %p565_p0 }
  0x21   : > { %472 = vmatpush.xpose.msk.msra.mxu0 %vm266_vm0, %v258_v3 }
  0x25   : > { %473 = vmatpush.xpose.msk.msra.mxu0 %vm266_vm0, %v257_v4 }
  0x29   : > { %474 = vmatpush.xpose.msk.msra.mxu0 %vm266_vm0, %v256_v5 }
  0x2d   : > { %475 = vmatpush.xpose.msk.msra.mxu0 %vm266_vm0, %v255_v6 }
  0x31   : > { %476 = vmatpush.xpose.msk.msra.mxu0 %vm266_vm0, %v254_v7 }
  0x35   : > { %477 = vmatpush.xpose.msk.msra.mxu0 %vm266_vm0, %v253_v8 }
  0x39   : > { %478 = vmatpush.xpose.msk.msra.mxu0 %vm266_vm0, %v252_v9 }
  0x3d   : > { %479 = vmatpush.xpose.msk.msra.mxu0 %vm266_vm0, %v251_v10 }
  0x41   : > { %480 = vmatpush.xpose.msk.msra.mxu0 %vm266_vm0, %v250_v11 }
  0x45   : > { %481 = vmatpush.xpose.msk.msra.mxu0 %vm266_vm0, %v249_v12 }
  0x49   : > { %482 = vmatpush.xpose.msk.msra.mxu0 %vm266_vm0, %v248_v13 }
  0x4d   : > { %483 = vmatpush.xpose.msk.msra.mxu0 %vm266_vm0, %v247_v14 }
  0x51   : > { %484 = vmatpush.xpose.msk.msra.mxu0 %vm266_vm0, %v246_v15 }
  0x54   : > { %485 = vmatmul.msk.f32.vlgmr.msra.gmra.mxu0 %vm266_vm0, %v245_v16 }
  0xd1   : > { %v335_v18 = vpop.f32.mrf.mxu0 }
  0xd2   : > { %v336_v19 = vadd.f32 %v545_v17, %v335_v18 }
  0xd4   : > { %338 = vst [vmem:[%s225_s10] sm:$0xff] %v336_v19 }
  0xd5   : > { %573 = shalt.err (!%p570_p5)
}
  0xd6   : > { %490 = dma.vmem_to_hbm [thread:$0]  (%p686_p4), %s354_s11, 128, %s356_s18, %s340_s19  }
  0xd7 PF: > { %p496_p6 = scmp.ge.s32.totalorder %s624_s17, 2  ;;  %s367_s29 = sand.u32 1, %s604_s12  }
  0xd8   : > { %s368_s4 = scalar_lea.sflag [#allocation3], %s367_s29 }
  0xd9   : > { %p493_p7 = pnand %p496_p6, %p693_p8 }
  0xdb   : > { %p494_p9 = pneg %p493_p7 }
  0xdd   : > { %599 = dma.done.wait (%p494_p9), %s368_s4, 128  }
  0xde   : > { %601 = vsyncadd (%p494_p9), %s368_s4, 4294967168  ;;  %s16_s17 = sadd.s32 1, %s624_s17   ;;  %s817_s12 = smov %s608_s13 }
  0xdf   : > { %p13_p10 = scmp.ge.s32.totalorder %s16_s17, 4   ;;  %s818_s13 = smov %s612_s14 }
  0xe0   : > { %s819_s14 = smov %s699_s25  ;;  %s820_s15 = smov %s620_s16 }
  0xe1   : > { %s821_s16 = smov %s823_s20  ;;  %15 = sbr.rel (!%p13_p10) target bundleno = 4 (0x4), region = 73 }
  0xe6   :  { %374 = vsyncpa [#allocation3], 1 }
  0xe7   :  { %376 = vsyncpa [#allocation3 + $0x1], 1 }

</bundles_post_ra>
